<compile_context>
chip_gen: v7x
topology: tpu7x:2x2x1
jax: 0.10.0
libtpu: 0.0.40
codegen_flags: <defaults>
</compile_context>

<pallas_src>
import functools

import jax
import jax.numpy as jnp
from jax.experimental import pallas as pl
from jax.experimental.pallas import tpu as pltpu

_LANE = 128
_SUB = 8
_TILE_ROWS = 8192  # 4 MiB f32 per input buffer per grid step


def _cdiv(a: int, b: int) -> int:
    return -(-a // b)


def _round_up(x: int, m: int) -> int:
    return ((x + m - 1) // m) * m


@functools.lru_cache(maxsize=1)
def _gen_params():
    """Generation-aware VMEM budgets (v5e/v6e: 128 MiB VMEM, v7x: 64 MiB)."""
    vmem = 64 << 20  # conservative default = v7x per-core physical VMEM
    try:
        get_info = getattr(pltpu, "get_tpu_info", None)
        if get_info is not None:
            v = int(getattr(get_info(), "vmem_capacity_bytes", 0))
            if v > 0:
                vmem = v
    except Exception:
        pass
    big = vmem >= (100 << 20)  # v5e/v6e vs v7x
    return {
        # Fused path slab budget, counted in f32 working-set bytes (so bf16
        # inputs that get upcast in-kernel are not under-counted).
        "fused_budget_bytes": min(vmem // 3, 40 << 20),
        "fused_vmem_limit": int(min(vmem * 3 // 4, 96 << 20)),
        # Tiled path: 2 inputs x 2 pipeline buffers x 4 MiB plus f32 temps.
        "tiled_vmem_limit": (64 << 20) if big else (48 << 20),
    }


def _to_slab(x):
    """Flatten to a lane-dense (rows, 128) slab, rows padded to a multiple of 8.

    Returns (slab, original_element_count). Padding is zero, so it contributes
    0 to both squared and absolute difference sums; means over the original
    count stay exact. Padding to 8 rows is free when size % 1024 == 0.
    """
    n = x.size
    rows = _round_up(max(1, _cdiv(n, _LANE)), _SUB)
    flat = x.reshape(-1)
    pad = rows * _LANE - n
    if pad:
        flat = jnp.pad(flat, (0, pad))
    return flat.reshape(rows, _LANE), n


# ---------------------------------------------------------------------------
# Fused single-launch kernel: everything in VMEM, all math in one kernel.
# ---------------------------------------------------------------------------
def _fused_cycle_loss_kernel(*refs, n_pairs, feat_counts, recon_count,
                             cycle_weight):
    out_ref = refs[-1]        # SMEM (2,) f32: [cycle_loss, weighted_loss]
    in_refs = refs[:-1]       # [tf0, cf0, tf1, cf1, ..., target, cycle]

    # Fold every MSE pair onto one (8,128) f32 accumulator with VPU adds;
    # pre-scale each pair's fold by 1/(count_i * n_pairs) so a single final
    # cross-lane reduce yields mean_i[ mean((c_i - t_i)^2) ].
    feat_acc = jnp.zeros((_SUB, _LANE), jnp.float32)
    for i in range(n_pairs):
        t = in_refs[2 * i][...].astype(jnp.float32)
        c = in_refs[2 * i + 1][...].astype(jnp.float32)
        d = c - t
        fold = (d * d).reshape(-1, _SUB, _LANE).sum(axis=0)
        feat_acc = feat_acc + fold * jnp.float32(1.0 / (feat_counts[i] * n_pairs))

    t = in_refs[2 * n_pairs][...].astype(jnp.float32)
    c = in_refs[2 * n_pairs + 1][...].astype(jnp.float32)
    recon_fold = jnp.abs(t - c).reshape(-1, _SUB, _LANE).sum(axis=0)

    feature_loss = jnp.sum(feat_acc)                       # single XLU reduce
    recon_loss = jnp.sum(recon_fold) * jnp.float32(1.0 / recon_count)
    cycle_loss = (feature_loss + recon_loss) * jnp.float32(0.5)
    out_ref[0] = cycle_loss
    out_ref[1] = cycle_loss * jnp.float32(cycle_weight)


def _fused_cycle_loss(target_tensor, cycle_tensor, target_features,
                      cycle_features, cycle_weight, params):
    slabs = []
    feat_counts = []
    for tf, cf in zip(target_features, cycle_features):
        ts, n = _to_slab(tf)
        cs, _ = _to_slab(cf)
        slabs += [ts, cs]
        feat_counts.append(n)
    tts, recon_count = _to_slab(target_tensor)
    cts, _ = _to_slab(cycle_tensor)
    slabs += [tts, cts]

    kernel = functools.partial(
        _fused_cycle_loss_kernel,
        n_pairs=len(feat_counts),
        feat_counts=tuple(float(c) for c in feat_counts),
        recon_count=float(recon_count),
        cycle_weight=float(cycle_weight),
    )
    total_elems = sum(int(s.size) for s in slabs)
    in_bytes = sum(int(s.size) * s.dtype.itemsize for s in slabs)
    out = pl.pallas_call(
        kernel,
        out_shape=jax.ShapeDtypeStruct((2,), jnp.float32),
        in_specs=[pl.BlockSpec(memory_space=pltpu.MemorySpace.VMEM)] * len(slabs),
        out_specs=pl.BlockSpec(memory_space=pltpu.MemorySpace.SMEM),
        compiler_params=pltpu.CompilerParams(
            vmem_limit_bytes=params["fused_vmem_limit"]),
        cost_estimate=pl.CostEstimate(flops=3 * total_elems, transcendentals=0,
                                      bytes_accessed=in_bytes + 8),
    )(*slabs)
    return out[0], out[1]


# ---------------------------------------------------------------------------
# Tiled fallback: big tiles, per-core (8,128) accumulator, lane-dense partial
# outputs; ragged / out-of-range tiles masked in-kernel (no tile-size padding).
# ---------------------------------------------------------------------------
def _tiled_sum_kernel(a_ref, b_ref, out_ref, acc_ref, *, op, steps, tile_rows,
                      rows8, needs_mask):
    s = pl.program_id(0)   # parallel split (one per TensorCore on v7x)
    k = pl.program_id(1)   # reduction steps within the split

    @pl.when(k == 0)
    def _():
        acc_ref[...] = jnp.zeros_like(acc_ref)

    d = a_ref[...].astype(jnp.float32) - b_ref[...].astype(jnp.float32)
    v = d * d if op == "sq" else jnp.abs(d)
    if needs_mask:
        # Mask rows past the end of the (rows8, 128) slab. This covers both
        # the ragged final tile and logical blocks that fall entirely past
        # the end (their index_map is clamped, so their data would otherwise
        # be double-counted).
        start = (s * steps + k) * tile_rows
        row = jax.lax.broadcasted_iota(jnp.int32, (tile_rows, _LANE), 0)
        v = jnp.where(row < (rows8 - start), v, jnp.float32(0.0))
    # Fold (tile_rows, 128) onto the (8, 128) accumulator with VPU adds only;
    # the cross-lane reduce happens once, in XLA, on the tiny partials.
    acc_ref[...] += v.reshape(-1, _SUB, _LANE).sum(axis=0)

    @pl.when(k == steps - 1)
    def _():
        out_ref[...] = acc_ref[...]


def _tiled_mean_diff(a, b, op, params):
    """mean((a-b)^2) if op=='sq' else mean(|a-b|), tiled reduction kernel."""
    assert a.shape == b.shape
    n = int(a.size)
    a2, _ = _to_slab(a)
    b2, _ = _to_slab(b)
    rows8 = a2.shape[0]

    tile_rows = min(_TILE_ROWS, rows8)           # multiple of 8 by construction
    nb = _cdiv(rows8, tile_rows)                 # logical row-block count
    n_splits = 2 if nb >= 2 else 1               # megacore split on v7x;
    steps = _cdiv(nb, n_splits)                  # harmless (serial) elsewhere
    needs_mask = (n_splits * steps * tile_rows) != rows8

    if n_splits * steps == nb:
        def in_map(s, k):
            return (s * steps + k, 0)
    else:
        def in_map(s, k):
            return (jnp.minimum(s * steps + k, nb - 1), 0)

    kernel = functools.partial(_tiled_sum_kernel, op=op, steps=steps,
                               tile_rows=tile_rows, rows8=rows8,
                               needs_mask=needs_mask)
    io_bytes = (int(a2.size) * a2.dtype.itemsize
                + int(b2.size) * b2.dtype.itemsize
                + n_splits * _SUB * _LANE * 4)
    # NOTE: the (8,128) scratch is per-TensorCore (VMEM is per-core), so the
    # parallel split is race-free; run serially it is re-zeroed at k == 0.
    partials = pl.pallas_call(
        kernel,
        out_shape=jax.ShapeDtypeStruct((n_splits, _SUB, _LANE), jnp.float32),
        grid_spec=pltpu.PrefetchScalarGridSpec(
            num_scalar_prefetch=0,
            grid=(n_splits, steps),
            in_specs=[
                pl.BlockSpec((tile_rows, _LANE), in_map),
                pl.BlockSpec((tile_rows, _LANE), in_map),
            ],
            out_specs=pl.BlockSpec((None, _SUB, _LANE),
                                   lambda s, k: (s, 0, 0)),
            scratch_shapes=[pltpu.VMEM((_SUB, _LANE), jnp.float32)],
        ),
        compiler_params=pltpu.CompilerParams(
            dimension_semantics=("parallel", "arbitrary"),
            vmem_limit_bytes=params["tiled_vmem_limit"]),
        cost_estimate=pl.CostEstimate(flops=3 * n, transcendentals=0,
                                      bytes_accessed=io_bytes),
    )(a2, b2)
    return jnp.sum(partials) / jnp.float32(n)


def _tiled_cycle_loss(target_tensor, cycle_tensor, target_features,
                      cycle_features, cycle_weight, params):
    per_feature = [
        _tiled_mean_diff(cf, tf, "sq", params)
        for tf, cf in zip(target_features, cycle_features)
    ]
    feature_loss = jnp.mean(jnp.stack(per_feature))
    recon = _tiled_mean_diff(target_tensor, cycle_tensor, "abs", params)
    cycle = (feature_loss + recon) * jnp.float32(0.5)
    return cycle, cycle * jnp.float32(cycle_weight)


# ---------------------------------------------------------------------------
# CycleLoss.forward equivalent.
#   feature_loss = mean_i [ mean over per-batch means of (cycle_i-target_i)^2 ]
#   recon        = mean |target - cycle|         (nn.L1Loss)
#   cycle_loss   = 0.5 * (feature_loss + recon)
#   weighted     = cycle_loss * cycle_weight
# ---------------------------------------------------------------------------
def cycle_loss_forward(target_tensor, cycle_tensor, target_features,
                       cycle_features, *, cycle_weight):
    params = _gen_params()
    all_tensors = (target_tensor, cycle_tensor, *target_features,
                   *cycle_features)
    # Budget the fused path in f32 working-set bytes (kernel upcasts to f32).
    f32_slab_bytes = 0
    for t in all_tensors:
        rows = _round_up(max(1, _cdiv(int(t.size), _LANE)), _SUB)
        f32_slab_bytes += rows * _LANE * 4

    if f32_slab_bytes <= params["fused_budget_bytes"]:
        return _fused_cycle_loss(target_tensor, cycle_tensor, target_features,
                                 cycle_features, cycle_weight, params)
    return _tiled_cycle_loss(target_tensor, cycle_tensor, target_features,
                             cycle_features, cycle_weight, params)


# ---------------------------------------------------------------------------
# Pure-JAX reference (mirrors the PyTorch module exactly).
# ---------------------------------------------------------------------------
def _reference(target_tensor, cycle_tensor, target_features, cycle_features,
               *, batch_size, cycle_weight):
    temps = []
    for tf, cf in zip(target_features, cycle_features):
        d2 = jnp.square(cf.astype(jnp.float32) - tf.astype(jnp.float32))
        temps.append(jnp.mean(jnp.mean(d2.reshape(batch_size, -1), axis=1)))
    feature_loss = jnp.mean(jnp.stack(temps))
    recon = jnp.mean(jnp.abs(target_tensor.astype(jnp.float32)
                             - cycle_tensor.astype(jnp.float32)))
    cl = (feature_loss + recon) * 0.5
    return cl, cl * cycle_weight


if __name__ == "__main__":
    batch_size = 2
    cycle_weight = 10.0

    key = jax.random.PRNGKey(0)
    k = jax.random.split(key, 10)

    # target / cycle images: NCHW (2, 4, 16, 16)
    target_tensor = jax.random.normal(k[0], (2, 4, 16, 16), jnp.float32)
    cycle_tensor = jax.random.normal(k[1], (2, 4, 16, 16), jnp.float32)

    # three intermediate feature maps (NCHW)
    feat_shapes = [(2, 8, 16, 16), (2, 16, 8, 8), (2, 32, 4, 4)]
    target_features = tuple(
        jax.random.normal(k[2 + i], s, jnp.float32)
        for i, s in enumerate(feat_shapes))
    cycle_features = tuple(
        jax.random.normal(k[5 + i], s, jnp.float32)
        for i, s in enumerate(feat_shapes))

    ref_cl, ref_wcl = _reference(
        target_tensor, cycle_tensor, target_features, cycle_features,
        batch_size=batch_size, cycle_weight=cycle_weight)

    # --- fused single-launch path (the one used for these shapes) ---
    cl, wcl = cycle_loss_forward(
        target_tensor, cycle_tensor, target_features, cycle_features,
        cycle_weight=cycle_weight)
    cl, wcl = jax.block_until_ready((cl, wcl))
    assert jnp.allclose(cl, ref_cl, rtol=1e-5, atol=1e-5), (cl, ref_cl)
    assert jnp.allclose(wcl, ref_wcl, rtol=1e-5, atol=1e-5), (wcl, ref_wcl)

    # --- tiled fallback, exercised on the same small shapes ---
    params = _gen_params()
    t_cl, t_wcl = _tiled_cycle_loss(
        target_tensor, cycle_tensor, target_features, cycle_features,
        cycle_weight, params)
    t_cl, t_wcl = jax.block_until_ready((t_cl, t_wcl))
    assert jnp.allclose(t_cl, ref_cl, rtol=1e-5, atol=1e-5), (t_cl, ref_cl)
    assert jnp.allclose(t_wcl, ref_wcl, rtol=1e-5, atol=1e-5), (t_wcl, ref_wcl)

    # --- tiled path on a large, unaligned shape: exercises the two-way
    #     (megacore) split, the ragged-final-tile mask and the clamped
    #     out-of-range logical blocks. ---
    ka, kb = jax.random.split(k[8])
    big_a = jax.random.normal(ka, (2, 1031, 1029), jnp.float32)
    big_b = jax.random.normal(kb, (2, 1031, 1029), jnp.float32)
    mse = jax.block_until_ready(_tiled_mean_diff(big_a, big_b, "sq", params))
    l1 = jax.block_until_ready(_tiled_mean_diff(big_a, big_b, "abs", params))
    ref_mse = jnp.mean(jnp.square(big_a - big_b))
    ref_l1 = jnp.mean(jnp.abs(big_a - big_b))
    assert jnp.allclose(mse, ref_mse, rtol=1e-4, atol=1e-6), (mse, ref_mse)
    assert jnp.allclose(l1, ref_l1, rtol=1e-4, atol=1e-6), (l1, ref_l1)

    print("KERNEL_OK")
</pallas_src>

<mosaic_0001>
module attributes {stable_mosaic.version = 11 : i64} {
  func.func @_fused_cycle_loss_kernel(%arg0: memref<32x128xf32, #tpu.memory_space<vmem>>, %arg1: memref<32x128xf32, #tpu.memory_space<vmem>>, %arg2: memref<16x128xf32, #tpu.memory_space<vmem>>, %arg3: memref<16x128xf32, #tpu.memory_space<vmem>>, %arg4: memref<8x128xf32, #tpu.memory_space<vmem>>, %arg5: memref<8x128xf32, #tpu.memory_space<vmem>>, %arg6: memref<16x128xf32, #tpu.memory_space<vmem>>, %arg7: memref<16x128xf32, #tpu.memory_space<vmem>>, %arg8: memref<2xf32, #tpu.memory_space<smem>>) attributes {dimension_semantics = [], scalar_prefetch = 0 : i64, scratch_operands = 0 : i64, tpu.core_type = #tpu.core_type<tc>} {
    %cst = arith.constant 0.000000e+00 : f32
    %0 = vector.broadcast %cst : f32 to vector<8x128xf32>
    %c0 = arith.constant 0 : index
    %c0_0 = arith.constant 0 : index
    %1 = vector.load %arg0[%c0, %c0_0] : memref<32x128xf32, #tpu.memory_space<vmem>>, vector<32x128xf32>
    %c0_1 = arith.constant 0 : index
    %c0_2 = arith.constant 0 : index
    %2 = vector.load %arg1[%c0_1, %c0_2] : memref<32x128xf32, #tpu.memory_space<vmem>>, vector<32x128xf32>
    %3 = arith.subf %2, %1 : vector<32x128xf32>
    %4 = arith.mulf %3, %3 : vector<32x128xf32>
    %5 = vector.shape_cast %4 : vector<32x128xf32> to vector<4x8x128xf32>
    %cst_3 = arith.constant dense<0.000000e+00> : vector<8x128xf32>
    %6 = vector.multi_reduction <add>, %5, %cst_3 [0] : vector<4x8x128xf32> to vector<8x128xf32>
    %cst_4 = arith.constant 8.13802107E-5 : f32
    %7 = vector.broadcast %cst_4 : f32 to vector<8x128xf32>
    %8 = arith.mulf %6, %7 : vector<8x128xf32>
    %9 = arith.addf %0, %8 : vector<8x128xf32>
    %c0_5 = arith.constant 0 : index
    %c0_6 = arith.constant 0 : index
    %10 = vector.load %arg2[%c0_5, %c0_6] : memref<16x128xf32, #tpu.memory_space<vmem>>, vector<16x128xf32>
    %c0_7 = arith.constant 0 : index
    %c0_8 = arith.constant 0 : index
    %11 = vector.load %arg3[%c0_7, %c0_8] : memref<16x128xf32, #tpu.memory_space<vmem>>, vector<16x128xf32>
    %12 = arith.subf %11, %10 : vector<16x128xf32>
    %13 = arith.mulf %12, %12 : vector<16x128xf32>
    %14 = vector.shape_cast %13 : vector<16x128xf32> to vector<2x8x128xf32>
    %cst_9 = arith.constant dense<0.000000e+00> : vector<8x128xf32>
    %15 = vector.multi_reduction <add>, %14, %cst_9 [0] : vector<2x8x128xf32> to vector<8x128xf32>
    %cst_10 = arith.constant 1.62760422E-4 : f32
    %16 = vector.broadcast %cst_10 : f32 to vector<8x128xf32>
    %17 = arith.mulf %15, %16 : vector<8x128xf32>
    %18 = arith.addf %9, %17 : vector<8x128xf32>
    %c0_11 = arith.constant 0 : index
    %c0_12 = arith.constant 0 : index
    %19 = vector.load %arg4[%c0_11, %c0_12] : memref<8x128xf32, #tpu.memory_space<vmem>>, vector<8x128xf32>
    %c0_13 = arith.constant 0 : index
    %c0_14 = arith.constant 0 : index
    %20 = vector.load %arg5[%c0_13, %c0_14] : memref<8x128xf32, #tpu.memory_space<vmem>>, vector<8x128xf32>
    %21 = arith.subf %20, %19 : vector<8x128xf32>
    %22 = arith.mulf %21, %21 : vector<8x128xf32>
    %23 = vector.shape_cast %22 : vector<8x128xf32> to vector<1x8x128xf32>
    %cst_15 = arith.constant dense<0.000000e+00> : vector<8x128xf32>
    %24 = vector.multi_reduction <add>, %23, %cst_15 [0] : vector<1x8x128xf32> to vector<8x128xf32>
    %cst_16 = arith.constant 3.25520843E-4 : f32
    %25 = vector.broadcast %cst_16 : f32 to vector<8x128xf32>
    %26 = arith.mulf %24, %25 : vector<8x128xf32>
    %27 = arith.addf %18, %26 : vector<8x128xf32>
    %c0_17 = arith.constant 0 : index
    %c0_18 = arith.constant 0 : index
    %28 = vector.load %arg6[%c0_17, %c0_18] : memref<16x128xf32, #tpu.memory_space<vmem>>, vector<16x128xf32>
    %c0_19 = arith.constant 0 : index
    %c0_20 = arith.constant 0 : index
    %29 = vector.load %arg7[%c0_19, %c0_20] : memref<16x128xf32, #tpu.memory_space<vmem>>, vector<16x128xf32>
    %30 = arith.subf %28, %29 : vector<16x128xf32>
    %31 = math.absf %30 : vector<16x128xf32>
    %32 = vector.shape_cast %31 : vector<16x128xf32> to vector<2x8x128xf32>
    %cst_21 = arith.constant dense<0.000000e+00> : vector<8x128xf32>
    %33 = vector.multi_reduction <add>, %32, %cst_21 [0] : vector<2x8x128xf32> to vector<8x128xf32>
    %34 = vector.shape_cast %27 : vector<8x128xf32> to vector<1x8x128xf32>
    %cst_22 = arith.constant dense<0.000000e+00> : vector<1xf32>
    %35 = vector.multi_reduction <add>, %34, %cst_22 [1, 2] : vector<1x8x128xf32> to vector<1xf32>
    %36 = vector.shape_cast %35 : vector<1xf32> to vector<1x1x1xf32>
    %37 = vector.extract %36[0, 0, 0] : f32 from vector<1x1x1xf32>
    %38 = vector.shape_cast %33 : vector<8x128xf32> to vector<1x8x128xf32>
    %cst_23 = arith.constant dense<0.000000e+00> : vector<1xf32>
    %39 = vector.multi_reduction <add>, %38, %cst_23 [1, 2] : vector<1x8x128xf32> to vector<1xf32>
    %40 = vector.shape_cast %39 : vector<1xf32> to vector<1x1x1xf32>
    %41 = vector.extract %40[0, 0, 0] : f32 from vector<1x1x1xf32>
    %cst_24 = arith.constant 4.8828125E-4 : f32
    %42 = arith.mulf %41, %cst_24 : f32
    %43 = arith.addf %37, %42 : f32
    %cst_25 = arith.constant 5.000000e-01 : f32
    %44 = arith.mulf %43, %cst_25 : f32
    %c0_26 = arith.constant 0 : index
    %45 = memref.load %arg8[%c0_26] : memref<2xf32, #tpu.memory_space<smem>>
    memref.store %44, %arg8[%c0_26] : memref<2xf32, #tpu.memory_space<smem>>
    %cst_27 = arith.constant 1.000000e+01 : f32
    %46 = arith.mulf %44, %cst_27 : f32
    %c1 = arith.constant 1 : index
    %47 = memref.load %arg8[%c1] : memref<2xf32, #tpu.memory_space<smem>>
    memref.store %46, %arg8[%c1] : memref<2xf32, #tpu.memory_space<smem>>
    return
  }
}

</mosaic_0001>

<bundles_post_ra>
// kernel: tpu_custom_call.1
= control target key start
LH: loop header
LB: loop body
LE: loop exit
PB: predicated region body
PF: predicated region fallthrough
CT: control target
= control target key end

     0   :  { %13 = vsyncpa [#allocation3], 0  ;;  %s586_s0 = inlined_call_operand.hbm [shape: f32[32,128], index: 0, kind: input, shape index: {}]   ;;  %s587_s1 = inlined_call_operand.hbm [shape: f32[32,128], index: 1, kind: input, shape index: {}]   ;;  %s588_s2 = inlined_call_operand.hbm [shape: f32[16,128], index: 2, kind: input, shape index: {}]   ;;  %s589_s3 = inlined_call_operand.hbm [shape: f32[16,128], index: 3, kind: input, shape index: {}]   ;;  %s590_s4 = inlined_call_operand.hbm [shape: f32[8,128], index: 4, kind: input, shape index: {}]   ;;  %s591_s5 = inlined_call_operand.hbm [shape: f32[8,128], index: 5, kind: input, shape index: {}]   ;;  %s592_s6 = inlined_call_operand.vmem [shape: f32[16,128], index: 6, kind: input, shape index: {}]   ;;  %s593_s7 = inlined_call_operand.hbm [shape: f32[16,128], index: 7, kind: input, shape index: {}]   ;;  %s594_s8 = inlined_call_operand.hbm [shape: f32[2], index: 8, kind: output, shape index: {}]  }
   0x1   :  { %14 = vsyncpa [#allocation6], 0 }
   0x2   :  { %15 = vsyncpa [#allocation9], 0 }
   0x3   :  { %16 = vsyncpa [#allocation12], 0 }
   0x4   :  { %17 = vsyncpa [#allocation4], 0  ;;  %s400_s27 = smov [#allocation5]   ;;  %s401_s29 = smov [#allocation8]  }
   0x5   :  { %s35_s28 = sshll.u32 %s400_s27, 4  ;;  %s59_s30 = sshll.u32 %s401_s29, 4  ;;  %s36_s28 = int_to_ptr.vmem [resolvable:$true] %s35_s28  ;;  %s455_s30 = int_to_ptr.vmem [resolvable:$true] %s59_s30 }
   0x6   :  { %s226_s11 = scalar_lea.hbm %s587_s1, 512 }
   0x7   :  { %p227_p0 = scmp.ne.s32.totalorder %s587_s1, %s226_s11  ;;  %p230_p1 = scmp.lt.u32.totalorder %s226_s11, %s587_s1 }
   0x9   :  { %p232_p2 = pnand %p230_p1, %p227_p0 }
   0xb   :  { %235 = shalt.err (!%p232_p2)
}
   0xc   :  { %s236_s16 = scalar_lea.vmem %s36_s28, 512  ;;  %p241_p4 = scmp.lt.s32.totalorder %s36_s28, %s36_s28 }
   0xd   :  { %p237_p3 = scmp.ne.s32.totalorder %s36_s28, %s236_s16  ;;  %p242_p5 = scmp.lt.s32.totalorder %s236_s16, %s236_s16 }
   0xf   :  { %p243_p6 = por %p242_p5, %p241_p4 }
  0x11   :  { %p244_p7 = pnand %p243_p6, %p237_p3 }
  0x13   :  { %247 = shalt.err (!%p244_p7)
}
  0x14   :  { %s402_s17 = smov 128   ;;  %s403_s18 = smov 8  }
  0x15   :  { %41 = dma.hbm_to_vmem [thread:$0]  %s587_s1, 512, %s36_s28, [#allocation6], %s402_s17, %s402_s17, %s403_s18  }
  0x16   :  { %s248_s23 = scalar_lea.hbm %s589_s3, 256 }
  0x17   :  { %p249_p8 = scmp.ne.s32.totalorder %s589_s3, %s248_s23  ;;  %p252_p9 = scmp.lt.u32.totalorder %s248_s23, %s589_s3 }
  0x19   :  { %p254_p10 = pnand %p252_p9, %p249_p8 }
  0x1b   :  { %257 = shalt.err (!%p254_p10)
}
  0x1c   :  { %s258_s29 = scalar_lea.vmem %s455_s30, 256  ;;  %p263_p12 = scmp.lt.s32.totalorder %s455_s30, %s455_s30 }
  0x1d   :  { %p259_p11 = scmp.ne.s32.totalorder %s455_s30, %s258_s29  ;;  %p264_p13 = scmp.lt.s32.totalorder %s258_s29, %s258_s29 }
  0x1f   :  { %p265_p0 = por %p264_p13, %p263_p12 }
  0x21   :  { %p266_p1 = pnand %p265_p0, %p259_p11 }
  0x23   :  { %269 = shalt.err (!%p266_p1)
}
  0x24   :  { %65 = dma.hbm_to_vmem [thread:$0]  %s589_s3, 256, %s455_s30, [#allocation9], %s402_s17, %s402_s17, %s403_s18  }
  0x25   :  { %s404_s9 = smov [#allocation11]   ;;  %s405_s11 = smov [#allocation2]  }
  0x26   :  { %s82_s10 = sshll.u32 %s404_s9, 4  ;;  %s23_s12 = sshll.u32 %s405_s11, 4  ;;  %s83_s10 = int_to_ptr.vmem [resolvable:$true] %s82_s10  ;;  %s492_s12 = int_to_ptr.vmem [resolvable:$true] %s23_s12 }
  0x27   :  { %s270_s15 = scalar_lea.hbm %s591_s5, 128 }
  0x28   :  { %p271_p2 = scmp.ne.s32.totalorder %s591_s5, %s270_s15  ;;  %p274_p3 = scmp.lt.u32.totalorder %s270_s15, %s591_s5 }
  0x2a   :  { %p276_p4 = pnand %p274_p3, %p271_p2 }
  0x2c   :  { %279 = shalt.err (!%p276_p4)
}
  0x2d   :  { %s280_s3 = scalar_lea.vmem %s83_s10, 128  ;;  %p285_p6 = scmp.lt.s32.totalorder %s83_s10, %s83_s10 }
  0x2e   :  { %p281_p5 = scmp.ne.s32.totalorder %s83_s10, %s280_s3  ;;  %p286_p7 = scmp.lt.s32.totalorder %s280_s3, %s280_s3 }
  0x30   :  { %p287_p8 = por %p286_p7, %p285_p6 }
  0x32   :  { %p288_p9 = pnand %p287_p8, %p281_p5 }
  0x34   :  { %291 = shalt.err (!%p288_p9)
}
  0x35   :  { %85 = dma.hbm_to_vmem [thread:$0]  %s591_s5, 128, %s83_s10, [#allocation12]  }
  0x36   :  { %s292_s25 = scalar_lea.hbm %s586_s0, 512 }
  0x37   :  { %p293_p10 = scmp.ne.s32.totalorder %s586_s0, %s292_s25  ;;  %p296_p11 = scmp.lt.u32.totalorder %s292_s25, %s586_s0 }
  0x39   :  { %p298_p12 = pnand %p296_p11, %p293_p10 }
  0x3b   :  { %301 = shalt.err (!%p298_p12)
}
  0x3c   :  { %s302_s28 = scalar_lea.vmem %s492_s12, 512  ;;  %p307_p0 = scmp.lt.s32.totalorder %s492_s12, %s492_s12 }
  0x3d   :  { %p303_p13 = scmp.ne.s32.totalorder %s492_s12, %s302_s28  ;;  %p308_p1 = scmp.lt.s32.totalorder %s302_s28, %s302_s28 }
  0x3f   :  { %p309_p2 = por %p308_p1, %p307_p0 }
  0x41   :  { %p310_p3 = pnand %p309_p2, %p303_p13 }
  0x43   :  { %313 = shalt.err (!%p310_p3)
}
  0x44   :  { %29 = dma.hbm_to_vmem [thread:$0]  %s586_s0, 512, %s492_s12, [#allocation3], %s402_s17, %s402_s17, %s403_s18  }
  0x45   :  { %s406_s10 = smov [#allocation7]   ;;  %s407_s13 = smov [#allocation10]  }
  0x46   :  { %s47_s11 = sshll.u32 %s406_s10, 4  ;;  %s72_s14 = sshll.u32 %s407_s13, 4  ;;  %s48_s11 = int_to_ptr.vmem [resolvable:$true] %s47_s11  ;;  %s73_s14 = int_to_ptr.vmem [resolvable:$true] %s72_s14 }
  0x47   :  { %s314_s19 = scalar_lea.hbm %s588_s2, 256 }
  0x48   :  { %p315_p4 = scmp.ne.s32.totalorder %s588_s2, %s314_s19  ;;  %p318_p5 = scmp.lt.u32.totalorder %s314_s19, %s588_s2 }
  0x4a   :  { %p320_p6 = pnand %p318_p5, %p315_p4 }
  0x4c   :  { %323 = shalt.err (!%p320_p6)
}
  0x4d   :  { %s324_s0 = scalar_lea.vmem %s48_s11, 256  ;;  %p329_p8 = scmp.lt.s32.totalorder %s48_s11, %s48_s11 }
  0x4e   :  { %p325_p7 = scmp.ne.s32.totalorder %s48_s11, %s324_s0  ;;  %p330_p9 = scmp.lt.s32.totalorder %s324_s0, %s324_s0 }
  0x50   :  { %p331_p10 = por %p330_p9, %p329_p8 }
  0x52   :  { %p332_p11 = pnand %p331_p10, %p325_p7 }
  0x54   :  { %335 = shalt.err (!%p332_p11)
}
  0x55   :  { %53 = dma.hbm_to_vmem [thread:$0]  %s588_s2, 256, %s48_s11, [#allocation6], %s402_s17, %s402_s17, %s403_s18  }
  0x56   :  { %s336_s25 = scalar_lea.hbm %s590_s4, 128 }
  0x57   :  { %p337_p12 = scmp.ne.s32.totalorder %s590_s4, %s336_s25  ;;  %p340_p13 = scmp.lt.u32.totalorder %s336_s25, %s590_s4 }
  0x59   :  { %p342_p0 = pnand %p340_p13, %p337_p12 }
  0x5b   :  { %345 = shalt.err (!%p342_p0)
}
  0x5c   :  { %s346_s28 = scalar_lea.vmem %s73_s14, 128  ;;  %p351_p2 = scmp.lt.s32.totalorder %s73_s14, %s73_s14 }
  0x5d   :  { %p347_p1 = scmp.ne.s32.totalorder %s73_s14, %s346_s28  ;;  %p352_p3 = scmp.lt.s32.totalorder %s346_s28, %s346_s28 }
  0x5f   :  { %p353_p4 = por %p352_p3, %p351_p2 }
  0x61   :  { %p354_p5 = pnand %p353_p4, %p347_p1 }
  0x63   :  { %357 = shalt.err (!%p354_p5)
}
  0x64   :  { %75 = dma.hbm_to_vmem [thread:$0]  %s590_s4, 128, %s73_s14, [#allocation9]  }
  0x65   :  { %s408_s9 = smov [#allocation13]   ;;  %s358_s15 = scalar_lea.hbm %s593_s7, 256 }
  0x66   :  { %s93_s10 = sshll.u32 %s408_s9, 4  ;;  %p359_p6 = scmp.ne.s32.totalorder %s593_s7, %s358_s15  ;;  %s94_s10 = int_to_ptr.vmem [resolvable:$true] %s93_s10 }
  0x67   :  { %p362_p7 = scmp.lt.u32.totalorder %s358_s15, %s593_s7 }
  0x69   :  { %p364_p8 = pnand %p362_p7, %p359_p6 }
  0x6b   :  { %367 = shalt.err (!%p364_p8)
}
  0x6c   :  { %s368_s3 = scalar_lea.vmem %s94_s10, 256  ;;  %p373_p10 = scmp.lt.s32.totalorder %s94_s10, %s94_s10 }
  0x6d   :  { %p369_p9 = scmp.ne.s32.totalorder %s94_s10, %s368_s3  ;;  %p374_p11 = scmp.lt.s32.totalorder %s368_s3, %s368_s3 }
  0x6f   :  { %p375_p12 = por %p374_p11, %p373_p10 }
  0x71   :  { %p376_p13 = pnand %p375_p12, %p369_p9 }
  0x73   :  { %379 = shalt.err (!%p376_p13)
}
  0x74   :  { %99 = dma.hbm_to_vmem [thread:$0]  %s593_s7, 256, %s94_s10, [#allocation12], %s402_s17, %s402_s17, %s403_s18  }
  0x75   :  { %390 = dma.done.wait [#allocation3], 512  }
  0x76   :  { %391 = vsyncadd [#allocation3], 4294966784 }
  0x77   :  { %392 = dma.done.wait [#allocation6], 768  }
  0x78   :  { %393 = vsyncadd [#allocation6], 4294966528 }
  0x79   :  { %394 = dma.done.wait [#allocation9], 384  }
  0x7a   :  { %395 = vsyncadd [#allocation9], 4294966912 }
  0x7b   :  { %396 = dma.done.wait [#allocation12], 384  }
  0x7c   :  { %397 = vsyncadd [#allocation12], 4294966912  ;;  %v121_v0 = vld [vmem:[#allocation2] sm:$0xff]  ;;  %v122_v1 = vld [vmem:[#allocation2 + $0x8] sm:$0xff]  ;;  %s380_s27 = scalar_lea.hbm %s594_s8, 16 }
  0x7d   :  { %v123_v2 = vld [vmem:[#allocation2 + $0x10] sm:$0xff]  ;;  %v124_v3 = vld [vmem:[#allocation2 + $0x18] sm:$0xff]  ;;  %v125_v4 = vld [vmem:[#allocation5] sm:$0xff]  ;;  %p381_p0 = scmp.ne.s32.totalorder %s594_s8, %s380_s27  ;;  %p384_p1 = scmp.lt.u32.totalorder %s380_s27, %s594_s8 }
  0x7e   :  { %v126_v5 = vld [vmem:[#allocation5 + $0x8] sm:$0xff]  ;;  %v127_v6 = vld [vmem:[#allocation5 + $0x10] sm:$0xff]  ;;  %v128_v7 = vld [vmem:[#allocation5 + $0x18] sm:$0xff]  ;;  %v129_v8 = vsub.f32 %v125_v4, %v121_v0 }
  0x7f   :  { %v130_v9 = vsub.f32 %v126_v5, %v122_v1  ;;  %v142_v10 = vld [vmem:[#allocation7] sm:$0xff]  ;;  %v131_v11 = vsub.f32 %v127_v6, %v123_v2  ;;  %v132_v12 = vsub.f32 %v128_v7, %v124_v3  ;;  %v143_v13 = vld [vmem:[#allocation7 + $0x8] sm:$0xff]  ;;  %v144_v14 = vld [vmem:[#allocation8] sm:$0xff]  ;;  %p386_p2 = pnand %p384_p1, %p381_p0 }
  0x80   :  { %v145_v15 = vld [vmem:[#allocation8 + $0x8] sm:$0xff]  ;;  %v133_v16 = vmul.f32 %v129_v8, %v129_v8  ;;  %v146_v18 = vsub.f32 %v144_v14, %v142_v10  ;;  %v153_v20 = vld [vmem:[#allocation10] sm:$0xff]  ;;  %v154_v21 = vld [vmem:[#allocation11] sm:$0xff] }
  0x81   :  { %v134_v17 = vmul.f32 %v130_v9, %v130_v9  ;;  %v147_v19 = vsub.f32 %v145_v15, %v143_v13  ;;  %v135_v22 = vmul.f32 %v131_v11, %v131_v11  ;;  %v155_v23 = vsub.f32 %v154_v21, %v153_v20  ;;  %v160_v28 = vld [vmem:[%s592_s6] sm:$0xff]  ;;  %v161_v29 = vld [vmem:[%s592_s6 + $0x8] sm:$0xff]  ;;  %v162_v30 = vld [vmem:[#allocation13] sm:$0xff] }
  0x82   :  { %v136_v24 = vmul.f32 %v132_v12, %v132_v12  ;;  %v148_v26 = vmul.f32 %v146_v18, %v146_v18  ;;  %v163_v31 = vld [vmem:[#allocation13 + $0x8] sm:$0xff]  ;;  %v164_v37 = vsub.f32 %v160_v28, %v162_v30 }
  0x83   :  { %v137_v25 = vadd.f32 %v134_v17, %v133_v16  ;;  %v149_v27 = vmul.f32 %v147_v19, %v147_v19  ;;  %v156_v34 = vmul.f32 %v155_v23, %v155_v23  ;;  %v165_v38 = vsub.f32 %v161_v29, %v163_v31 }
  0x84   :  { %v166_v42 = vand.u32 2147483647, %v164_v37 }
  0x85   :  { %v138_v32 = vadd.f32 %v137_v25, %v135_v22  ;;  %v150_v33 = vadd.f32 %v149_v27, %v148_v26  ;;  %v158_v40 = vmul.f32 0.00032552084, %v156_v34  ;;  %v167_v43 = vand.u32 2147483647, %v165_v38 }
  0x87   :  { %v139_v35 = vadd.f32 %v138_v32, %v136_v24  ;;  %v151_v36 = vmul.f32 0.00016276042, %v150_v33  ;;  %v168_v45 = vadd.f32 %v167_v43, %v166_v42 }
  0x89   :  { %v140_v39 = vmul.f32 8.138021e-05, %v139_v35 }
  0x8b   :  { %v152_v41 = vadd.f32 %v151_v36, %v140_v39 }
  0x8d   :  { %v159_v44 = vadd.f32 %v158_v40, %v152_v41 }
  0x8f   :  { %169 = vadd.xlane.f32.xlu0 %v159_v44 }
  0x93   :  { %178 = vadd.xlane.f32.xlu0 %v168_v45 }
 0x11c   :  { %v170_v46 = vpop.xlane.xlu0 %169 }
 0x11d   :  { %v171_v47 = vrot.slane %v170_v46, 4 }
 0x11f   :  { %v172_v48 = vadd.f32 %v171_v47, %v170_v46 }
 0x120   :  { %v179_v49 = vpop.xlane.xlu0 %178 }
 0x121   :  { %v173_v50 = vrot.slane %v172_v48, 2  ;;  %v180_v51 = vrot.slane %v179_v49, 4 }
 0x123   :  { %v181_v52 = vadd.f32 %v180_v51, %v179_v49  ;;  %v174_v53 = vadd.f32 %v173_v50, %v172_v48 }
 0x125   :  { %v182_v54 = vrot.slane %v181_v52, 2  ;;  %v175_v55 = vrot.slane %v174_v53, 1 }
 0x127   :  { %v183_v56 = vadd.f32 %v182_v54, %v181_v52  ;;  %v176_v57 = vadd.f32 %v175_v55, %v174_v53 }
 0x129   :  { %212 = vpush %v176_v57  ;;  %v184_v58 = vrot.slane %v183_v56, 1 }
 0x12b   :  { %v185_v59 = vadd.f32 %v184_v58, %v183_v56 }
 0x12d   :  { %214 = vpush %v185_v59 }
 0x15a   :  { %s213_s6 = spop %212 }
 0x15e   :  { %s215_s0 = spop %214 }
 0x15f   :  { %s187_s12 = smul.f32 0.00048828125, %s215_s0 }
 0x161   :  { %s188_s22 = sadd.f32 %s213_s6, %s187_s12 }
 0x163   :  { %s189_s23 = smul.f32 0.5, %s188_s22 }
 0x165   :  { %s192_s24 = smul.f32 10.0, %s189_s23  ;;  %191 = sst [smem:[#allocation14]] %s189_s23 }
 0x167   :  { %194 = sst [smem:[#allocation14 + $0x1]] %s192_s24 }
 0x168   :  { %389 = shalt.err (!%p386_p2)
}
 0x169   :  { %s409_s5 = smov [#allocation14]  }
 0x16a   :  { %202 = dma.smem_to_hbm %s409_s5, 16, %s594_s8, [#allocation4]  }
 0x16b   :  { %398 = dma.done.wait [#allocation4], 16  }
 0x16c   :  { %399 = vsyncadd [#allocation4], 4294967280 }
 0x16d   :  { %206 = sfence }
 0x16e   :  { %207 = vsyncpa [#allocation3], 1 }
 0x16f   :  { %208 = vsyncpa [#allocation6], 1 }
 0x170   :  { %209 = vsyncpa [#allocation9], 1 }
 0x171   :  { %210 = vsyncpa [#allocation12], 1 }
 0x172   :  { %211 = vsyncpa [#allocation4], 1 }

</bundles_post_ra>
